<compile_context>
chip_gen: v7x
topology: tpu7x:2x2x1
jax: 0.10.0
libtpu: 0.0.40
codegen_flags: <defaults>
</compile_context>

<pallas_src>
import math

import jax
import jax.numpy as jnp
from jax.experimental import pallas as pl
from jax.experimental.pallas import tpu as pltpu

POOL_SIZES = (1, 2, 3, 6)
EPS = 1e-5


# ----------------------------------------------------------------------------
# Wrapper-side JAX helpers (all outputs are tiny: <= 6x6 grids or (H|W)-sized matrices).
# ----------------------------------------------------------------------------
def pool_matrix(p, size):
    """(p, size) averaging matrix implementing adaptive_avg_pool bins along one axis."""
    rows = []
    for i in range(p):
        a, b = (i * size) // p, -((-(i + 1) * size) // p)
        row = [0.0] * size
        inv = 1.0 / float(b - a)
        for t in range(a, b):
            row[t] = inv
        rows.append(row)
    return jnp.array(rows, jnp.float32)


def interp_matrix(out_size, in_size):
    """1-D bilinear interpolation matrix, align_corners=True (matches F.interpolate)."""
    rows = []
    for i in range(out_size):
        row = [0.0] * in_size
        src = 0.0 if (in_size == 1 or out_size == 1) else i * (in_size - 1) / (out_size - 1)
        i0 = min(int(math.floor(src)), in_size - 1)
        i1 = min(i0 + 1, in_size - 1)
        w1 = src - i0
        row[i0] += 1.0 - w1
        row[i1] += w1
        rows.append(row)
    return jnp.array(rows, jnp.float32)


def fold_bn(gamma, beta, mean, var, eps=EPS):
    s = gamma / jnp.sqrt(var + eps)
    return s, beta - s * mean


def adaptive_avg_pool_nhwc(x, p):
    """Reference-only adaptive average pool on NHWC."""
    N, H, W, C = x.shape
    rows = []
    for i in range(p):
        h0, h1 = (i * H) // p, -((-(i + 1) * H) // p)
        cols = []
        for j in range(p):
            w0, w1 = (j * W) // p, -((-(j + 1) * W) // p)
            cols.append(jnp.mean(x[:, h0:h1, w0:w1, :], axis=(1, 2)))
        rows.append(jnp.stack(cols, axis=1))
    return jnp.stack(rows, axis=1)                    # (N, p, p, C)


# ----------------------------------------------------------------------------
# Pallas kernel: one (image, row-block) per grid step — two MXU matmuls + bias + ReLU.
# ----------------------------------------------------------------------------
def _pyramid_pooling_kernel(x_ref, a_ref, wx_ref, g_ref, bias_ref, o_ref):
    """
    x_ref:    (1, TH*W, Cin)   bf16  flattened input pixels of this row block (streamed)
    a_ref:    (TH*W, PP)       bf16  per-pixel bilinear weights of all branches (streamed)
    wx_ref:   (Cin, Cout)      bf16  BN-scale-folded out-conv slice acting on x (resident)
    g_ref:    (1, PP, Cout)    bf16  pooled/projected/BN-scaled branch grids   (resident per n)
    bias_ref: (1, Cout)        f32   folded BatchNorm bias of the out conv
    o_ref:    (1, TH*W, Cout)  f32
    """
    acc = jnp.dot(x_ref[0], wx_ref[...], preferred_element_type=jnp.float32)   # direct path
    acc = acc + jnp.dot(a_ref[...], g_ref[0], preferred_element_type=jnp.float32)  # pyramid
    o_ref[0] = jnp.maximum(acc + bias_ref[...], 0.0)


# ----------------------------------------------------------------------------
# Generation-aware tiling helpers.
# ----------------------------------------------------------------------------
def _vmem_budget_bytes():
    """~75% of this generation's VMEM (96 MiB on v5e/v6e, 48 MiB on v7x)."""
    try:
        cap = int(getattr(pltpu.get_tpu_info(), "vmem_capacity_bytes", 64 * 1024 * 1024))
    except Exception:
        cap = 64 * 1024 * 1024
    cap = max(cap, 32 * 1024 * 1024)
    return (cap // 4) * 3


def _derive_tile_h(H, W, Cin, Cout, PP, budget):
    """Largest row block (multiple of 8) whose double-buffered tiles fit the VMEM budget."""
    per_row = 2 * W * Cin * 2 + 2 * W * PP * 2 + 2 * W * Cout * 4   # x + A + out (dbl-buffered)
    resident = 2 * (Cin * Cout * 2 + PP * Cout * 2 + Cout * 4)      # wx + G + bias
    avail = max((budget * 3) // 5 - resident, per_row * 8)          # keep headroom for scratch
    th = (avail // per_row) // 8 * 8
    th = min(th, max(8, (4096 // max(W, 1)) // 8 * 8))              # cap per-step matmul M
    th = min(th, ((H + 7) // 8) * 8)                                # never exceed padded H
    return max(int(th), 8)


# ----------------------------------------------------------------------------
# Forward wrapper (PyTorch-style NCHW in / NCHW out).
# ----------------------------------------------------------------------------
def pyramid_pooling(x_nchw, branch_params, w_out, bn_out):
    """branch_params: 4x (w_1x1 (Cin,hidden), bn_scale (hidden,), bn_bias (hidden,)) for
    pool sizes 1/2/3/6; w_out: (2*Cin, Cout); bn_out: (scale (Cout,), bias (Cout,))."""
    x = jnp.transpose(x_nchw, (0, 2, 3, 1)).astype(jnp.float32)          # NHWC, f32 for pooling
    N, H, W, Cin = x.shape
    Cout = w_out.shape[1]
    hidden = branch_params[0][0].shape[1]
    PP = sum(p * p for p in POOL_SIZES)                                   # 50
    s_out, b_out = bn_out

    # --- tiny pyramid branches; single pass over x produces all four pooled tensors ---
    aw_pool = jnp.concatenate([pool_matrix(p, W) for p in POOL_SIZES], axis=0)   # (12, W)
    xw = jnp.einsum('aw,nhwc->nhac', aw_pool, x)                                  # (N,H,12,Cin)
    g_parts, a_parts, off = [], [], 0
    for k, p in enumerate(POOL_SIZES):
        w_b, s_b, b_b = branch_params[k]
        pooled = jnp.einsum('bh,nhac->nbac', pool_matrix(p, H), xw[:, :, off:off + p, :])
        g = jnp.maximum(jnp.einsum('nabc,ch->nabh', pooled, w_b) * s_b + b_b, 0.0)
        w_slice = w_out[Cin + k * hidden: Cin + (k + 1) * hidden, :]              # (hidden,Cout)
        proj = jnp.einsum('nabh,ho->nabo', g, w_slice) * s_out                    # BN scale folded
        g_parts.append(proj.reshape(N, p * p, Cout))
        a_parts.append(jnp.einsum('ha,wb->hwab', interp_matrix(H, p),
                                  interp_matrix(W, p)).reshape(H, W, p * p))
        off += p
    g_all = jnp.concatenate(g_parts, axis=1).astype(jnp.bfloat16)                 # (N, PP, Cout)
    a_pix = jnp.concatenate(a_parts, axis=2)                                      # (H, W, PP)

    wx = (w_out[:Cin, :] * s_out[None, :]).astype(jnp.bfloat16)                   # (Cin, Cout)
    bias = b_out.reshape(1, Cout).astype(jnp.float32)

    # --- generation-aware row-block tiling (pad H instead of searching divisors) ---
    budget = _vmem_budget_bytes()
    th = _derive_tile_h(H, W, Cin, Cout, PP, budget)
    Hp = -(-H // th) * th
    if Hp != H:
        x = jnp.pad(x, ((0, 0), (0, Hp - H), (0, 0), (0, 0)))
        a_pix = jnp.pad(a_pix, ((0, Hp - H), (0, 0), (0, 0)))
    x_flat = x.reshape(N, Hp * W, Cin).astype(jnp.bfloat16)                       # bf16 at boundary
    a_pix = a_pix.reshape(Hp * W, PP).astype(jnp.bfloat16)

    grid = (N, Hp // th)
    flops = 2 * N * Hp * W * (Cin + PP) * Cout + 3 * N * Hp * W * Cout
    bytes_accessed = (x_flat.size * 2 + N * a_pix.size * 2 + wx.size * 2
                      + g_all.size * 2 + bias.size * 4 + N * Hp * W * Cout * 4)

    out_flat = pl.pallas_call(
        _pyramid_pooling_kernel,
        out_shape=jax.ShapeDtypeStruct((N, Hp * W, Cout), jnp.float32),
        grid=grid,
        in_specs=[
            pl.BlockSpec((1, th * W, Cin), lambda n, hb: (n, hb, 0)),
            pl.BlockSpec((th * W, PP),     lambda n, hb: (hb, 0)),
            pl.BlockSpec((Cin, Cout),      lambda n, hb: (0, 0)),
            pl.BlockSpec((1, PP, Cout),    lambda n, hb: (n, 0, 0)),
            pl.BlockSpec((1, Cout),        lambda n, hb: (0, 0)),
        ],
        out_specs=pl.BlockSpec((1, th * W, Cout), lambda n, hb: (n, hb, 0)),
        compiler_params=pltpu.CompilerParams(
            dimension_semantics=("parallel", "parallel"),
            vmem_limit_bytes=int(budget)),
        cost_estimate=pl.CostEstimate(flops=flops, transcendentals=0,
                                      bytes_accessed=bytes_accessed),
    )(x_flat, a_pix, wx, g_all, bias)

    out = out_flat.reshape(N, Hp, W, Cout)[:, :H]
    return jnp.transpose(out, (0, 3, 1, 2))                                       # NCHW


# ----------------------------------------------------------------------------
# Pure-JAX reference (module-order computation) for sanity checking.
# ----------------------------------------------------------------------------
def pyramid_pooling_reference(x_nchw, branch_params, w_out, bn_out):
    x = jnp.transpose(x_nchw, (0, 2, 3, 1)).astype(jnp.float32)
    N, H, W, Cin = x.shape
    feats = [x]
    for k, p in enumerate(POOL_SIZES):
        w_b, s_b, b_b = branch_params[k]
        pooled = adaptive_avg_pool_nhwc(x, p)
        g = jnp.maximum(jnp.einsum('nabc,ch->nabh', pooled, w_b) * s_b + b_b, 0.0)
        ah, aw = interp_matrix(H, p), interp_matrix(W, p)
        feats.append(jnp.einsum('ya,xb,nabh->nyxh', ah, aw, g))
    cat = jnp.concatenate(feats, axis=-1)                                          # (N,H,W,2Cin)
    s_out, b_out = bn_out
    out = jnp.maximum(jnp.einsum('nyxc,co->nyxo', cat, w_out) * s_out + b_out, 0.0)
    return jnp.transpose(out, (0, 3, 1, 2))


if __name__ == "__main__":
    key = jax.random.PRNGKey(0)
    k_x, k_out, *k_branch = jax.random.split(key, 2 + len(POOL_SIZES))

    # small shapes consistent with the module (hidden = in_channel // 4);
    # W=20 exercises uneven adaptive-pool bins for pool sizes 3 and 6.
    N, Cin, Cout, H, W = 2, 16, 32, 24, 20
    hidden = Cin // 4

    x = jax.random.normal(k_x, (N, Cin, H, W), jnp.float32)

    def make_convbnrelu(k, cin, cout, w_scale):
        kw, kg, kb, km, kv = jax.random.split(k, 5)
        w = w_scale * jax.random.normal(kw, (cin, cout), jnp.float32)   # 1x1 conv, bias=False
        gamma = 1.0 + 0.1 * jax.random.normal(kg, (cout,), jnp.float32)
        beta = 0.1 * jax.random.normal(kb, (cout,), jnp.float32)
        mean = 0.05 * jax.random.normal(km, (cout,), jnp.float32)
        var = 1.0 + 0.1 * jnp.abs(jax.random.normal(kv, (cout,), jnp.float32))
        s, b = fold_bn(gamma, beta, mean, var)
        return w, s, b

    branch_params = [make_convbnrelu(k_branch[i], Cin, hidden, 0.3)
                     for i in range(len(POOL_SIZES))]
    w_out, s_out, b_out = make_convbnrelu(k_out, 2 * Cin, Cout, 0.2)

    out = pyramid_pooling(x, branch_params, w_out, (s_out, b_out))
    out = jax.block_until_ready(out)

    ref = jax.block_until_ready(
        pyramid_pooling_reference(x, branch_params, w_out, (s_out, b_out)))
    err = float(jnp.max(jnp.abs(out - ref)))
    tol = 5e-2 * max(1.0, float(jnp.max(jnp.abs(ref))))   # kernel uses bf16 MXU inputs
    if err > tol:
        raise AssertionError(f"mismatch vs reference: max abs err {err} (tol {tol})")

    print("KERNEL_OK")
</pallas_src>

<mosaic_0001>
module attributes {stable_mosaic.version = 11 : i64} {
  func.func @_pyramid_pooling_kernel(%arg0: i32, %arg1: i32, %arg2: memref<1x480x16xbf16, #tpu.memory_space<vmem>>, %arg3: memref<480x50xbf16, #tpu.memory_space<vmem>>, %arg4: memref<16x32xbf16, #tpu.memory_space<vmem>>, %arg5: memref<1x50x32xbf16, #tpu.memory_space<vmem>>, %arg6: memref<1x32xf32, #tpu.memory_space<vmem>>, %arg7: memref<1x480x32xf32, #tpu.memory_space<vmem>>) attributes {dimension_semantics = [#tpu.dimension_semantics<parallel>, #tpu.dimension_semantics<parallel>], iteration_bounds = array<i64: 2, 1>, scalar_prefetch = 0 : i64, scratch_operands = 0 : i64, tpu.core_type = #tpu.core_type<tc>, window_params = [{transform_indices = @transform_0, window_bounds = array<i64: 1, 480, 16>}, {transform_indices = @transform_1, window_bounds = array<i64: 480, 50>}, {pipeline_mode = #tpu.pipeline_mode<synchronous>, transform_indices = @transform_2, window_bounds = array<i64: 16, 32>}, {transform_indices = @transform_3, window_bounds = array<i64: 1, 50, 32>}, {pipeline_mode = #tpu.pipeline_mode<synchronous>, transform_indices = @transform_4, window_bounds = array<i64: 1, 32>}, {transform_indices = @transform_5, window_bounds = array<i64: 1, 480, 32>}]} {
    %c0 = arith.constant 0 : index
    %c0_0 = arith.constant 0 : index
    %c0_1 = arith.constant 0 : index
    %0 = vector.load %arg2[%c0, %c0_0, %c0_1] : memref<1x480x16xbf16, #tpu.memory_space<vmem>>, vector<1x480x16xbf16>
    %1 = vector.shape_cast %0 : vector<1x480x16xbf16> to vector<480x16xbf16>
    %c0_2 = arith.constant 0 : index
    %c0_3 = arith.constant 0 : index
    %2 = vector.load %arg4[%c0_2, %c0_3] : memref<16x32xbf16, #tpu.memory_space<vmem>>, vector<16x32xbf16>
    %cst = arith.constant dense<0.000000e+00> : vector<480x32xf32>
    %3 = tpu.matmul %1, %2, %cst {dimension_numbers = #tpu.dot_dimension_numbers<[1], [0], [0], [1], [0, 0, 1, 1], [], []>} : vector<480x16xbf16>, vector<16x32xbf16>, vector<480x32xf32> -> vector<480x32xf32>
    %c0_4 = arith.constant 0 : index
    %c0_5 = arith.constant 0 : index
    %4 = vector.load %arg3[%c0_4, %c0_5] : memref<480x50xbf16, #tpu.memory_space<vmem>>, vector<480x50xbf16>
    %c0_6 = arith.constant 0 : index
    %c0_7 = arith.constant 0 : index
    %c0_8 = arith.constant 0 : index
    %5 = vector.load %arg5[%c0_6, %c0_7, %c0_8] : memref<1x50x32xbf16, #tpu.memory_space<vmem>>, vector<1x50x32xbf16>
    %6 = vector.shape_cast %5 : vector<1x50x32xbf16> to vector<50x32xbf16>
    %cst_9 = arith.constant dense<0.000000e+00> : vector<480x32xf32>
    %7 = tpu.matmul %4, %6, %cst_9 {dimension_numbers = #tpu.dot_dimension_numbers<[1], [0], [0], [1], [0, 0, 1, 1], [], []>} : vector<480x50xbf16>, vector<50x32xbf16>, vector<480x32xf32> -> vector<480x32xf32>
    %8 = arith.addf %3, %7 : vector<480x32xf32>
    %c0_10 = arith.constant 0 : index
    %c0_11 = arith.constant 0 : index
    %9 = vector.load %arg6[%c0_10, %c0_11] : memref<1x32xf32, #tpu.memory_space<vmem>>, vector<1x32xf32>
    %10 = vector.broadcast %9 : vector<1x32xf32> to vector<480x32xf32>
    %11 = arith.addf %8, %10 : vector<480x32xf32>
    %cst_12 = arith.constant 0.000000e+00 : f32
    %12 = vector.broadcast %cst_12 : f32 to vector<480x32xf32>
    %13 = arith.maximumf %11, %12 : vector<480x32xf32>
    %c0_13 = arith.constant 0 : index
    %c0_14 = arith.constant 0 : index
    %c0_15 = arith.constant 0 : index
    %14 = vector.load %arg7[%c0_13, %c0_14, %c0_15] : memref<1x480x32xf32, #tpu.memory_space<vmem>>, vector<1x480x32xf32>
    %15 = vector.shape_cast %14 : vector<1x480x32xf32> to vector<480x32xf32>
    %16 = vector.shape_cast %13 : vector<480x32xf32> to vector<1x480x32xf32>
    tpu.vector_store %arg7[%c0_13, %c0_14, %c0_15], %16 {strides = array<i32>} : memref<1x480x32xf32, #tpu.memory_space<vmem>>, vector<1x480x32xf32>,
    return
  }
  func.func @transform_0(%arg0: i32, %arg1: i32) -> (i32, i32, i32) {
    %c0_i32 = arith.constant 0 : i32
    %c0_i32_0 = arith.constant 0 : i32
    return %arg0, %arg1, %c0_i32 : i32, i32, i32
  }
  func.func @transform_1(%arg0: i32, %arg1: i32) -> (i32, i32) {
    %c0_i32 = arith.constant 0 : i32
    %c0_i32_0 = arith.constant 0 : i32
    return %arg1, %c0_i32 : i32, i32
  }
  func.func @transform_2(%arg0: i32, %arg1: i32) -> (i32, i32) {
    %c0_i32 = arith.constant 0 : i32
    %c0_i32_0 = arith.constant 0 : i32
    %c0_i32_1 = arith.constant 0 : i32
    return %c0_i32, %c0_i32_0 : i32, i32
  }
  func.func @transform_3(%arg0: i32, %arg1: i32) -> (i32, i32, i32) {
    %c0_i32 = arith.constant 0 : i32
    %c0_i32_0 = arith.constant 0 : i32
    %c0_i32_1 = arith.constant 0 : i32
    return %arg0, %c0_i32, %c0_i32_0 : i32, i32, i32
  }
  func.func @transform_4(%arg0: i32, %arg1: i32) -> (i32, i32) {
    %c0_i32 = arith.constant 0 : i32
    %c0_i32_0 = arith.constant 0 : i32
    %c0_i32_1 = arith.constant 0 : i32
    return %c0_i32, %c0_i32_0 : i32, i32
  }
  func.func @transform_5(%arg0: i32, %arg1: i32) -> (i32, i32, i32) {
    %c0_i32 = arith.constant 0 : i32
    %c0_i32_0 = arith.constant 0 : i32
    return %arg0, %arg1, %c0_i32 : i32, i32, i32
  }
}

</mosaic_0001>

<bundles_post_ra>
// kernel: tpu_custom_call.1
= control target key start
LH: loop header
LB: loop body
LE: loop exit
PB: predicated region body
PF: predicated region fallthrough
CT: control target
= control target key end

     0   :  { %s2336_s18 = smov 0   ;;  %s2338_s19 = smov 0   ;;  %s2749_s0 = inlined_call_operand.vmem [shape: bf16[2,480,16], index: 0, kind: input, shape index: {}]   ;;  %s2750_s1 = inlined_call_operand.vmem [shape: bf16[480,50], index: 1, kind: input, shape index: {}]   ;;  %s2751_s2 = inlined_call_operand.vmem [shape: bf16[16,32], index: 2, kind: input, shape index: {}]   ;;  %s2752_s3 = inlined_call_operand.vmem [shape: bf16[2,50,32], index: 3, kind: input, shape index: {}]   ;;  %s2753_s4 = inlined_call_operand.vmem [shape: f32[1,32], index: 4, kind: input, shape index: {}]   ;;  %s2754_s5 = inlined_call_operand.vmem [shape: f32[2,480,32], index: 5, kind: output, shape index: {}]  }
   0x1   :  { %s2340_s20 = smov 0  }
   0x2 LB: > { %s27_s21 = sadd.s32 1, %s2300_s19  ;;  %p1802_p0 = scmp.ge.s32.totalorder %s2304_s20, 1  ;;  %s2304_s20 = sphi %s2340_s20, %s15_s20   ;;  %s2300_s19 = sphi %s2338_s19, %s2756_s19   ;;  %s2296_s18 = sphi %s2336_s18, %s2755_s18  }
   0x3   : > { %p29_p1 = scmp.ge.s32.totalorder %s27_s21, 2  ;;  %p229_p2 = scmp.lt.s32.totalorder %s2304_s20, 3 }
   0x5   : > { %s2758_s21 = smov (%p29_p1, %s27_s21), 0  ;;  %p230_p3 = pnand %p1802_p0, %p229_p2 }
   0x6   : > { %p276_p4 = scmp.lt.s32.totalorder (!%p230_p3), %s2296_s18, 1  ;;  %v2220_v0 = vld [vmem:[%s2751_s2] sm:$0xff] (!%p230_p3)   ;;  %vm607_vm0 = vcmask (!%p230_p3), 408576   ;;  %vm1131_vm1 = vcmask (!%p230_p3), 130048   ;;  %vm698_vm2 = vcmask (!%p230_p3), 1040384   ;;  %v2225_v12 = vld [vmem:[%s2750_s1 + $0x8] sm:$0xff] (!%p230_p3)  }
   0x7   : > { %233 = sbr.rel (%p230_p3) target bundleno = 370 (0x172), region = 40  ;;  %2067 = vmatprep.subr.bf16.mxu0 (!%p230_p3), %v2220_v0  ;;  %v2224_v1 = vld [vmem:[%s2750_s1] sm:$0xff] (!%p230_p3)   ;;  %v2228_v13 = vld [vmem:[%s2750_s1 + $0x10] sm:$0xff] (!%p230_p3)   ;;  %v2229_v16 = vld [vmem:[%s2750_s1 + $0x18] sm:$0xff] (!%p230_p3)   ;;  %vm1622_vm3 = vcmask (!%p230_p3), 261120  }
   0x8   : > { %2068 = vmatpush3.bf16.msra.mxu0 (!%p230_p3), %v2220_v0  ;;  %2007 = vmatprep.mubr.msk.bf16.mxu1 (!%p230_p3), %vm607_vm0, %v2224_v1  ;;  %v2232_v17 = vld [vmem:[%s2750_s1 + $0x20] sm:$0xff] (!%p230_p3)   ;;  %v2233_v20 = vld [vmem:[%s2750_s1 + $0x28] sm:$0xff] (!%p230_p3)   ;;  %v2236_v21 = vld [vmem:[%s2750_s1 + $0x30] sm:$0xff] (!%p230_p3)  }
   0x9   : > { %v2237_v24 = vld [vmem:[%s2750_s1 + $0x38] sm:$0xff] (!%p230_p3)   ;;  %v2240_v25 = vld [vmem:[%s2750_s1 + $0x40] sm:$0xff] (!%p230_p3)   ;;  %v2241_v28 = vld [vmem:[%s2750_s1 + $0x48] sm:$0xff] (!%p230_p3)  }
   0xa   : > { %v2244_v29 = vld [vmem:[%s2750_s1 + $0x50] sm:$0xff] (!%p230_p3)   ;;  %v2245_v32 = vld [vmem:[%s2750_s1 + $0x58] sm:$0xff] (!%p230_p3)   ;;  %v2248_v33 = vld [vmem:[%s2750_s1 + $0x60] sm:$0xff] (!%p230_p3)  }
   0xb   : > { %v2249_v36 = vld [vmem:[%s2750_s1 + $0x68] sm:$0xff] (!%p230_p3)   ;;  %v2252_v37 = vld [vmem:[%s2750_s1 + $0x70] sm:$0xff] (!%p230_p3)   ;;  %v2253_v40 = vld [vmem:[%s2750_s1 + $0x78] sm:$0xff] (!%p230_p3)  }
   0xc   : > { %v2256_v41 = vld [vmem:[%s2750_s1 + $0x80] sm:$0xff] (!%p230_p3)   ;;  %v2257_v44 = vld [vmem:[%s2750_s1 + $0x88] sm:$0xff] (!%p230_p3)   ;;  %v2260_v45 = vld [vmem:[%s2750_s1 + $0x90] sm:$0xff] (!%p230_p3)  }
   0xd   : > { %v2261_v48 = vld [vmem:[%s2750_s1 + $0x98] sm:$0xff] (!%p230_p3)   ;;  %v2264_v49 = vld [vmem:[%s2750_s1 + $0xa0] sm:$0xff] (!%p230_p3)   ;;  %v2265_v52 = vld [vmem:[%s2750_s1 + $0xa8] sm:$0xff] (!%p230_p3)  }
   0xe   : > { %s2760_s18 = smov (!%p276_p4, %s2296_s18), 1  ;;  %v2268_v53 = vld [vmem:[%s2750_s1 + $0xb0] sm:$0xff]   ;;  %v2269_v56 = vld [vmem:[%s2750_s1 + $0xb8] sm:$0xff]   ;;  %v2272_v57 = vld [vmem:[%s2750_s1 + $0xc0] sm:$0xff]  }
   0xf   : > { %s2190_s26 = smul.u32 240, %s2760_s18  ;;  %v2273_v60 = vld [vmem:[%s2750_s1 + $0xc8] sm:$0xff]   ;;  %v2276_v61 = vld [vmem:[%s2750_s1 + $0xd0] sm:$0xff]   ;;  %v2277_v63 = vld [vmem:[%s2750_s1 + $0xd8] sm:$0xff]  }
  0x10   : > { %s2191_s27 = smul.u32 28, %s2760_s18  ;;  %v2280_v0 = vld [vmem:[%s2750_s1 + $0xe0] sm:$0xff]   ;;  %v2281_v1 = vld [vmem:[%s2750_s1 + $0xe8] sm:$0xff]  }
  0x11   : > { %s2368_s30 = scalar_lea.vmem %s2749_s0, %s2190_s26  ;;  %s2192_s6 = smul.u32 480, %s2760_s18 }
  0x12   : > { %s295_s8 = scalar_lea.vmem %s2752_s3, %s2191_s27  ;;  %v2222_v2 = vld [vmem:[%s2368_s30] sm:$0xff]   ;;  %v2223_v6 = vld [vmem:[%s2368_s30 + $0x8] sm:$0xff]   ;;  %v2226_v7 = vld [vmem:[%s2368_s30 + $0x10] sm:$0xff]  }
  0x13   : > { %v2217_v3 = vld [vmem:[%s295_s8] sm:$0xff]   ;;  %v2218_v4 = vld [vmem:[%s295_s8 + $0x8] sm:$0xff]   ;;  %2069 = vmatprep.mubr.msk.bf16.mxu0 %vm1131_vm1, %v2222_v2  ;;  %v2219_v5 = vld [vmem:[%s295_s8 + $0x10] sm:$0xff]   ;;  %s2559_s11 = scalar_lea.vmem %s2754_s5, %s2192_s6 }
  0x14   : > { %1999 = vmatprep.subr.bf16.mxu1 %v2217_v3  ;;  %2070 = vmatmul.mubr.msk.bf16.vlgmr.msra.gmra.mrb[0].mxu0 %vm1131_vm1, %v2223_v6  ;;  %v2221_v8 = vld [vmem:[%s295_s8 + $0x18] ss:$0 sps:$4 sm:$0x11]   ;;  %v2230_v10 = vld [vmem:[%s2368_s30 + $0x20] sm:$0xff]   ;;  %v2231_v14 = vld [vmem:[%s2368_s30 + $0x28] sm:$0xff]  }
  0x15   : > { %2000 = vmatpush3.bf16.msra.mxu1 %v2217_v3  ;;  %2073 = vmatprep.mubr.msk.bf16.mxu0 %vm1131_vm1, %v2226_v7  ;;  %v2227_v9 = vld [vmem:[%s2368_s30 + $0x18] sm:$0xff]   ;;  %v700_v11 = vsel %vm698_vm2, %v2221_v8, 0  ;;  %v2234_v15 = vld [vmem:[%s2368_s30 + $0x30] sm:$0xff]   ;;  %v2238_v19 = vld [vmem:[%s2368_s30 + $0x40] sm:$0xff]  }
  0x16   : > { %2001 = vmatprep.subr.bf16.mxu1 %v2218_v4  ;;  %v2235_v18 = vld [vmem:[%s2368_s30 + $0x38] sm:$0xff]   ;;  %v2239_v22 = vld [vmem:[%s2368_s30 + $0x48] sm:$0xff]   ;;  %v2242_v23 = vld [vmem:[%s2368_s30 + $0x50] sm:$0xff]  }
  0x17   : > { %v2243_v26 = vld [vmem:[%s2368_s30 + $0x58] sm:$0xff]   ;;  %v2246_v27 = vld [vmem:[%s2368_s30 + $0x60] sm:$0xff]   ;;  %v2247_v30 = vld [vmem:[%s2368_s30 + $0x68] sm:$0xff]  }
  0x18   : > { %v2250_v31 = vld [vmem:[%s2368_s30 + $0x70] sm:$0xff]   ;;  %v2251_v34 = vld [vmem:[%s2368_s30 + $0x78] sm:$0xff]   ;;  %v2254_v35 = vld [vmem:[%s2368_s30 + $0x80] sm:$0xff]  }
  0x19   : > { %2002 = vmatpush3.bf16.msra.mxu1 %v2218_v4  ;;  %v2255_v38 = vld [vmem:[%s2368_s30 + $0x88] sm:$0xff]   ;;  %v2258_v39 = vld [vmem:[%s2368_s30 + $0x90] sm:$0xff]   ;;  %v2259_v42 = vld [vmem:[%s2368_s30 + $0x98] sm:$0xff]  }
  0x1a   : > { %2003 = vmatprep.subr.bf16.mxu1 %v2219_v5  ;;  %v2262_v43 = vld [vmem:[%s2368_s30 + $0xa0] sm:$0xff]   ;;  %v2263_v46 = vld [vmem:[%s2368_s30 + $0xa8] sm:$0xff]   ;;  %v2266_v47 = vld [vmem:[%s2368_s30 + $0xb0] sm:$0xff]  }
  0x1b   : > { %v2267_v50 = vld [vmem:[%s2368_s30 + $0xb8] sm:$0xff]   ;;  %v2270_v51 = vld [vmem:[%s2368_s30 + $0xc0] sm:$0xff]   ;;  %v2271_v54 = vld [vmem:[%s2368_s30 + $0xc8] sm:$0xff]  }
  0x1c   : > { %2074 = vmatmul.mubr.msk.bf16.gmra.mrb[4].mxu0 %vm1131_vm1, %v2227_v9  ;;  %v2274_v55 = vld [vmem:[%s2368_s30 + $0xd0] sm:$0xff]   ;;  %v2275_v58 = vld [vmem:[%s2368_s30 + $0xd8] sm:$0xff]   ;;  %v2278_v59 = vld [vmem:[%s2368_s30 + $0xe0] sm:$0xff]  }
  0x1d   : > { %2004 = vmatpush3.bf16.msra.mxu1 %v2219_v5  ;;  %2077 = vmatprep.mubr.msk.bf16.mxu0 %vm1131_vm1, %v2230_v10  ;;  %v2279_v62 = vld [vmem:[%s2368_s30 + $0xe8] sm:$0xff]  }
  0x1e   : > { %2189 = vmatprep.subr.msk.bf16.mxu1 %vm698_vm2, %v2221_v8 }
  0x21   : > { %2006 = vmatpush3.bf16.msra.mxu1 %v700_v11  ;;  %v2553_v11 = vld [vmem:[%s2753_s4] ss:$0 sm:$0xff] }
  0x24   : > { %2008 = vmatmul.mubr.msk.bf16.vlgmr.msra.gmra.mrb[0].mxu1 %vm607_vm0, %v2225_v12  ;;  %2078 = vmatmul.mubr.msk.bf16.gmra.mrb[8].mxu0 %vm1131_vm1, %v2231_v14 }
  0x25   : > { %2011 = vmatprep.mubr.msk.bf16.mxu1 %vm607_vm0, %v2228_v13  ;;  %2081 = vmatprep.mubr.msk.bf16.mxu0 %vm1131_vm1, %v2234_v15 }
  0x2c   : > { %2012 = vmatmul.mubr.msk.bf16.gmra.mrb[4].mxu1 %vm607_vm0, %v2229_v16  ;;  %2082 = vmatmul.mubr.msk.bf16.gmra.mrb[12].mxu0 %vm1131_vm1, %v2235_v18 }
  0x2d   : > { %2015 = vmatprep.mubr.msk.bf16.mxu1 %vm607_vm0, %v2232_v17  ;;  %2085 = vmatprep.mubr.msk.bf16.mxu0 %vm1131_vm1, %v2238_v19 }
  0x34   : > { %2016 = vmatmul.mubr.msk.bf16.gmra.mrb[8].mxu1 %vm607_vm0, %v2233_v20  ;;  %2086 = vmatmul.mubr.msk.bf16.gmra.mrb[16].mxu0 %vm1131_vm1, %v2239_v22 }
  0x35   : > { %2019 = vmatprep.mubr.msk.bf16.mxu1 %vm607_vm0, %v2236_v21  ;;  %2089 = vmatprep.mubr.msk.bf16.mxu0 %vm1131_vm1, %v2242_v23 }
  0x3c   : > { %2020 = vmatmul.mubr.msk.bf16.gmra.mrb[12].mxu1 %vm607_vm0, %v2237_v24  ;;  %2090 = vmatmul.mubr.msk.bf16.gmra.mrb[20].mxu0 %vm1131_vm1, %v2243_v26 }
  0x3d   : > { %2023 = vmatprep.mubr.msk.bf16.mxu1 %vm607_vm0, %v2240_v25  ;;  %2093 = vmatprep.mubr.msk.bf16.mxu0 %vm1131_vm1, %v2246_v27 }
  0x44   : > { %2024 = vmatmul.mubr.msk.bf16.gmra.mrb[16].mxu1 %vm607_vm0, %v2241_v28  ;;  %2094 = vmatmul.mubr.msk.bf16.gmra.mrb[24].mxu0 %vm1131_vm1, %v2247_v30 }
  0x45   : > { %2027 = vmatprep.mubr.msk.bf16.mxu1 %vm607_vm0, %v2244_v29  ;;  %2097 = vmatprep.mubr.msk.bf16.mxu0 %vm1131_vm1, %v2250_v31 }
  0x4c   : > { %2028 = vmatmul.mubr.msk.bf16.gmra.mrb[20].mxu1 %vm607_vm0, %v2245_v32  ;;  %2098 = vmatmul.mubr.msk.bf16.gmra.mrb[28].mxu0 %vm1131_vm1, %v2251_v34 }
  0x4d   : > { %2031 = vmatprep.mubr.msk.bf16.mxu1 %vm607_vm0, %v2248_v33  ;;  %2101 = vmatprep.mubr.msk.bf16.mxu0 %vm1131_vm1, %v2254_v35 }
  0x54   : > { %2032 = vmatmul.mubr.msk.bf16.gmra.mrb[24].mxu1 %vm607_vm0, %v2249_v36  ;;  %2102 = vmatmul.mubr.msk.bf16.gmra.mrb[32].mxu0 %vm1131_vm1, %v2255_v38 }
  0x55   : > { %2035 = vmatprep.mubr.msk.bf16.mxu1 %vm607_vm0, %v2252_v37  ;;  %2105 = vmatprep.mubr.msk.bf16.mxu0 %vm1131_vm1, %v2258_v39 }
  0x5c   : > { %2036 = vmatmul.mubr.msk.bf16.gmra.mrb[28].mxu1 %vm607_vm0, %v2253_v40  ;;  %2106 = vmatmul.mubr.msk.bf16.gmra.mrb[36].mxu0 %vm1131_vm1, %v2259_v42 }
  0x5d   : > { %2039 = vmatprep.mubr.msk.bf16.mxu1 %vm607_vm0, %v2256_v41  ;;  %2109 = vmatprep.mubr.msk.bf16.mxu0 %vm1131_vm1, %v2262_v43 }
  0x64   : > { %2040 = vmatmul.mubr.msk.bf16.gmra.mrb[32].mxu1 %vm607_vm0, %v2257_v44  ;;  %2110 = vmatmul.mubr.msk.bf16.gmra.mrb[40].mxu0 %vm1131_vm1, %v2263_v46 }
  0x65   : > { %2043 = vmatprep.mubr.msk.bf16.mxu1 %vm607_vm0, %v2260_v45  ;;  %2113 = vmatprep.mubr.msk.bf16.mxu0 %vm1131_vm1, %v2266_v47 }
  0x6c   : > { %2044 = vmatmul.mubr.msk.bf16.gmra.mrb[36].mxu1 %vm607_vm0, %v2261_v48  ;;  %2114 = vmatmul.mubr.msk.bf16.gmra.mrb[44].mxu0 %vm1131_vm1, %v2267_v50 }
  0x6d   : > { %2047 = vmatprep.mubr.msk.bf16.mxu1 %vm607_vm0, %v2264_v49  ;;  %2117 = vmatprep.mubr.msk.bf16.mxu0 %vm1131_vm1, %v2270_v51 }
  0x74   : > { %2048 = vmatmul.mubr.msk.bf16.gmra.mrb[40].mxu1 %vm607_vm0, %v2265_v52  ;;  %2118 = vmatmul.mubr.msk.bf16.gmra.mrb[48].mxu0 %vm1131_vm1, %v2271_v54 }
  0x75   : > { %2051 = vmatprep.mubr.msk.bf16.mxu1 %vm607_vm0, %v2268_v53  ;;  %2121 = vmatprep.mubr.msk.bf16.mxu0 %vm1131_vm1, %v2274_v55 }
  0x7c   : > { %2052 = vmatmul.mubr.msk.bf16.gmra.mrb[44].mxu1 %vm607_vm0, %v2269_v56  ;;  %2122 = vmatmul.mubr.msk.bf16.gmra.mrb[52].mxu0 %vm1131_vm1, %v2275_v58 }
  0x7d   : > { %2055 = vmatprep.mubr.msk.bf16.mxu1 %vm607_vm0, %v2272_v57  ;;  %2125 = vmatprep.mubr.msk.bf16.mxu0 %vm1131_vm1, %v2278_v59 }
  0x84   : > { %2056 = vmatmul.mubr.msk.bf16.gmra.mrb[48].mxu1 %vm607_vm0, %v2273_v60  ;;  %2126 = vmatmul.mubr.msk.bf16.gmra.mrb[56].mxu0 %vm1131_vm1, %v2279_v62 }
  0x85   : > { %2059 = vmatprep.mubr.msk.bf16.mxu1 %vm607_vm0, %v2276_v61 }
  0x8c   : > { %2060 = vmatmul.mubr.msk.bf16.gmra.mrb[52].mxu1 %vm607_vm0, %v2277_v63 }
  0x8d   : > { %2063 = vmatprep.mubr.msk.bf16.mxu1 %vm607_vm0, %v2280_v0 }
  0x94   : > { %2064 = vmatmul.mubr.msk.bf16.gmra.mrb[56].mxu1 %vm607_vm0, %v2281_v1 }
  0xe7   : > { %v2071_v2 = vpop.f32.mrb[0].mxu0 }
  0xe8   : > { %v1256_v3 = vpop.f32.mrb[1].mxu0 }
  0xe9   : > { %v2072_v4 = vpop.f32.mrb[2].mxu0 }
  0xea   : > { %v1259_v5 = vpop.f32.mrb[3].mxu0 }
  0xef   : > { %v2075_v6 = vpop.f32.mrb[4].mxu0 }
  0xf0   : > { %v1272_v7 = vpop.f32.mrb[5].mxu0 }
  0xf1   : > { %v2076_v8 = vpop.f32.mrb[6].mxu0 }
  0xf2   : > { %v1275_v9 = vpop.f32.mrb[7].mxu0 }
  0xf7   : > { %v2009_v10 = vpop.f32.mrb[0].mxu1  ;;  %v2079_v19 = vpop.f32.mrb[8].mxu0 }
  0xf8   : > { %v1265_v12 = vadd.f32 %v2071_v2, %v2009_v10  ;;  %v736_v13 = vpop.f32.mrb[1].mxu1  ;;  %v1288_v22 = vpop.f32.mrb[9].mxu0 }
  0xf9   : > { %v1257_v14 = vadd.f32 %v1256_v3, %v736_v13  ;;  %v2010_v15 = vpop.f32.mrb[2].mxu1  ;;  %v2080_v25 = vpop.f32.mrb[10].mxu0 }
  0xfa   : > { %v1504_v16 = vadd.f32 %v2553_v11, %v1265_v12  ;;  %v1268_v17 = vadd.f32 %v2072_v4, %v2010_v15  ;;  %v739_v18 = vpop.f32.mrb[3].mxu1  ;;  %v1291_v28 = vpop.f32.mrb[11].mxu0 }
  0xfb   : > { %v1502_v20 = vadd.f32 %v2553_v11, %v1257_v14  ;;  %v1260_v21 = vadd.f32 %v1259_v5, %v739_v18 }
  0xfc   : > { %v1564_v23 = vmax.f32 %v1504_v16, 0.0  ;;  %v1505_v24 = vadd.f32 %v2553_v11, %v1268_v17 }
  0xfd   : > { %v1562_v26 = vmax.f32 %v1502_v20, 0.0  ;;  %v1503_v27 = vadd.f32 %v2553_v11, %v1260_v21 }
  0xfe   : > { %1625 = vst.msk [vmem:[%s2559_s11 + $0x10] sm:$0xff] %vm1622_vm3, %v1564_v23  ;;  %v1565_v29 = vmax.f32 %v1505_v24, 0.0 }
  0xff   : > { %1623 = vst.msk [vmem:[%s2559_s11] sm:$0xff] %vm1622_vm3, %v1562_v26  ;;  %v1563_v30 = vmax.f32 %v1503_v27, 0.0  ;;  %v2013_v31 = vpop.f32.mrb[4].mxu1  ;;  %v2083_v39 = vpop.f32.mrb[12].mxu0 }
 0x100   : > { %1626 = vst.msk [vmem:[%s2559_s11 + $0x18] sm:$0xff] %vm1622_vm3, %v1565_v29  ;;  %v1281_v32 = vadd.f32 %v2075_v6, %v2013_v31  ;;  %v752_v33 = vpop.f32.mrb[5].mxu1  ;;  %v1304_v42 = vpop.f32.mrb[13].mxu0 }
 0x101   : > { %1624 = vst.msk [vmem:[%s2559_s11 + $0x8] sm:$0xff] %vm1622_vm3, %v1563_v30  ;;  %v1273_v34 = vadd.f32 %v1272_v7, %v752_v33  ;;  %v2014_v35 = vpop.f32.mrb[6].mxu1  ;;  %v2084_v45 = vpop.f32.mrb[14].mxu0 }
 0x102   : > { %v1508_v36 = vadd.f32 %v2553_v11, %v1281_v32  ;;  %v1284_v37 = vadd.f32 %v2076_v8, %v2014_v35  ;;  %v755_v38 = vpop.f32.mrb[7].mxu1  ;;  %v1307_v48 = vpop.f32.mrb[15].mxu0 }
 0x103   : > { %v1506_v40 = vadd.f32 %v2553_v11, %v1273_v34  ;;  %v1276_v41 = vadd.f32 %v1275_v9, %v755_v38 }
 0x104   : > { %v1568_v43 = vmax.f32 %v1508_v36, 0.0  ;;  %v1509_v44 = vadd.f32 %v2553_v11, %v1284_v37 }
 0x105   : > { %v1566_v46 = vmax.f32 %v1506_v40, 0.0  ;;  %v1507_v47 = vadd.f32 %v2553_v11, %v1276_v41 }
 0x106   : > { %1629 = vst.msk [vmem:[%s2559_s11 + $0x30] sm:$0xff] %vm1622_vm3, %v1568_v43  ;;  %v1569_v49 = vmax.f32 %v1509_v44, 0.0 }
 0x107   : > { %1627 = vst.msk [vmem:[%s2559_s11 + $0x20] sm:$0xff] %vm1622_vm3, %v1566_v46  ;;  %v1567_v50 = vmax.f32 %v1507_v47, 0.0  ;;  %v2017_v51 = vpop.f32.mrb[8].mxu1  ;;  %v2087_v59 = vpop.f32.mrb[16].mxu0 }
 0x108   : > { %1630 = vst.msk [vmem:[%s2559_s11 + $0x38] sm:$0xff] %vm1622_vm3, %v1569_v49  ;;  %v1297_v52 = vadd.f32 %v2079_v19, %v2017_v51  ;;  %v768_v53 = vpop.f32.mrb[9].mxu1  ;;  %v1320_v62 = vpop.f32.mrb[17].mxu0 }
 0x109   : > { %1628 = vst.msk [vmem:[%s2559_s11 + $0x28] sm:$0xff] %vm1622_vm3, %v1567_v50  ;;  %v1289_v54 = vadd.f32 %v1288_v22, %v768_v53  ;;  %v2018_v55 = vpop.f32.mrb[10].mxu1  ;;  %v2088_v1 = vpop.f32.mrb[18].mxu0 }
 0x10a   : > { %v1512_v56 = vadd.f32 %v2553_v11, %v1297_v52  ;;  %v1300_v57 = vadd.f32 %v2080_v25, %v2018_v55  ;;  %v771_v58 = vpop.f32.mrb[11].mxu1  ;;  %v1323_v4 = vpop.f32.mrb[19].mxu0 }
 0x10b   : > { %v1510_v60 = vadd.f32 %v2553_v11, %v1289_v54  ;;  %v1292_v61 = vadd.f32 %v1291_v28, %v771_v58 }
 0x10c   : > { %v1572_v63 = vmax.f32 %v1512_v56, 0.0  ;;  %v1513_v0 = vadd.f32 %v2553_v11, %v1300_v57 }
 0x10d   : > { %v1570_v2 = vmax.f32 %v1510_v60, 0.0  ;;  %v1511_v3 = vadd.f32 %v2553_v11, %v1292_v61 }
 0x10e   : > { %1633 = vst.msk [vmem:[%s2559_s11 + $0x50] sm:$0xff] %vm1622_vm3, %v1572_v63  ;;  %v1573_v5 = vmax.f32 %v1513_v0, 0.0 }
 0x10f   : > { %1631 = vst.msk [vmem:[%s2559_s11 + $0x40] sm:$0xff] %vm1622_vm3, %v1570_v2  ;;  %v1571_v6 = vmax.f32 %v1511_v3, 0.0  ;;  %v2021_v7 = vpop.f32.mrb[12].mxu1  ;;  %v2091_v16 = vpop.f32.mrb[20].mxu0 }
 0x110   : > { %1634 = vst.msk [vmem:[%s2559_s11 + $0x58] sm:$0xff] %vm1622_vm3, %v1573_v5  ;;  %v1313_v8 = vadd.f32 %v2083_v39, %v2021_v7  ;;  %v784_v9 = vpop.f32.mrb[13].mxu1  ;;  %v1336_v19 = vpop.f32.mrb[21].mxu0 }
 0x111   : > { %1632 = vst.msk [vmem:[%s2559_s11 + $0x48] sm:$0xff] %vm1622_vm3, %v1571_v6  ;;  %v1305_v10 = vadd.f32 %v1304_v42, %v784_v9  ;;  %v2022_v12 = vpop.f32.mrb[14].mxu1  ;;  %v2092_v22 = vpop.f32.mrb[22].mxu0 }
 0x112   : > { %v1516_v13 = vadd.f32 %v2553_v11, %v1313_v8  ;;  %v1316_v14 = vadd.f32 %v2084_v45, %v2022_v12  ;;  %v787_v15 = vpop.f32.mrb[15].mxu1  ;;  %v1339_v25 = vpop.f32.mrb[23].mxu0 }
 0x113   : > { %v1514_v17 = vadd.f32 %v2553_v11, %v1305_v10  ;;  %v1308_v18 = vadd.f32 %v1307_v48, %v787_v15 }
 0x114   : > { %v1576_v20 = vmax.f32 %v1516_v13, 0.0  ;;  %v1517_v21 = vadd.f32 %v2553_v11, %v1316_v14 }
 0x115   : > { %v1574_v23 = vmax.f32 %v1514_v17, 0.0  ;;  %v1515_v24 = vadd.f32 %v2553_v11, %v1308_v18 }
 0x116   : > { %1637 = vst.msk [vmem:[%s2559_s11 + $0x70] sm:$0xff] %vm1622_vm3, %v1576_v20  ;;  %v1577_v26 = vmax.f32 %v1517_v21, 0.0 }
 0x117   : > { %1635 = vst.msk [vmem:[%s2559_s11 + $0x60] sm:$0xff] %vm1622_vm3, %v1574_v23  ;;  %v1575_v27 = vmax.f32 %v1515_v24, 0.0  ;;  %v2025_v28 = vpop.f32.mrb[16].mxu1  ;;  %v2095_v36 = vpop.f32.mrb[24].mxu0 }
 0x118   : > { %1638 = vst.msk [vmem:[%s2559_s11 + $0x78] sm:$0xff] %vm1622_vm3, %v1577_v26  ;;  %v1329_v29 = vadd.f32 %v2087_v59, %v2025_v28  ;;  %v800_v30 = vpop.f32.mrb[17].mxu1  ;;  %v1352_v39 = vpop.f32.mrb[25].mxu0 }
 0x119   : > { %1636 = vst.msk [vmem:[%s2559_s11 + $0x68] sm:$0xff] %vm1622_vm3, %v1575_v27  ;;  %v1321_v31 = vadd.f32 %v1320_v62, %v800_v30  ;;  %v2026_v32 = vpop.f32.mrb[18].mxu1  ;;  %v2096_v42 = vpop.f32.mrb[26].mxu0 }
 0x11a   : > { %v1520_v33 = vadd.f32 %v2553_v11, %v1329_v29  ;;  %v1332_v34 = vadd.f32 %v2088_v1, %v2026_v32  ;;  %v803_v35 = vpop.f32.mrb[19].mxu1  ;;  %v1355_v45 = vpop.f32.mrb[27].mxu0 }
 0x11b   : > { %v1518_v37 = vadd.f32 %v2553_v11, %v1321_v31  ;;  %v1324_v38 = vadd.f32 %v1323_v4, %v803_v35 }
 0x11c   : > { %v1580_v40 = vmax.f32 %v1520_v33, 0.0  ;;  %v1521_v41 = vadd.f32 %v2553_v11, %v1332_v34 }
 0x11d   : > { %v1578_v43 = vmax.f32 %v1518_v37, 0.0  ;;  %v1519_v44 = vadd.f32 %v2553_v11, %v1324_v38 }
 0x11e   : > { %1641 = vst.msk [vmem:[%s2559_s11 + $0x90] sm:$0xff] %vm1622_vm3, %v1580_v40  ;;  %v1581_v46 = vmax.f32 %v1521_v41, 0.0 }
 0x11f   : > { %1639 = vst.msk [vmem:[%s2559_s11 + $0x80] sm:$0xff] %vm1622_vm3, %v1578_v43  ;;  %v1579_v47 = vmax.f32 %v1519_v44, 0.0  ;;  %v2029_v48 = vpop.f32.mrb[20].mxu1  ;;  %v2099_v56 = vpop.f32.mrb[28].mxu0 }
 0x120   : > { %1642 = vst.msk [vmem:[%s2559_s11 + $0x98] sm:$0xff] %vm1622_vm3, %v1581_v46  ;;  %v1345_v49 = vadd.f32 %v2091_v16, %v2029_v48  ;;  %v816_v50 = vpop.f32.mrb[21].mxu1  ;;  %v1368_v59 = vpop.f32.mrb[29].mxu0 }
 0x121   : > { %1640 = vst.msk [vmem:[%s2559_s11 + $0x88] sm:$0xff] %vm1622_vm3, %v1579_v47  ;;  %v1337_v51 = vadd.f32 %v1336_v19, %v816_v50  ;;  %v2030_v52 = vpop.f32.mrb[22].mxu1  ;;  %v2100_v62 = vpop.f32.mrb[30].mxu0 }
 0x122   : > { %v1524_v53 = vadd.f32 %v2553_v11, %v1345_v49  ;;  %v1348_v54 = vadd.f32 %v2092_v22, %v2030_v52  ;;  %v819_v55 = vpop.f32.mrb[23].mxu1  ;;  %v1371_v1 = vpop.f32.mrb[31].mxu0 }
 0x123   : > { %v1522_v57 = vadd.f32 %v2553_v11, %v1337_v51  ;;  %v1340_v58 = vadd.f32 %v1339_v25, %v819_v55 }
 0x124   : > { %v1584_v60 = vmax.f32 %v1524_v53, 0.0  ;;  %v1525_v61 = vadd.f32 %v2553_v11, %v1348_v54 }
 0x125   : > { %v1582_v63 = vmax.f32 %v1522_v57, 0.0  ;;  %v1523_v0 = vadd.f32 %v2553_v11, %v1340_v58 }
 0x126   : > { %1645 = vst.msk [vmem:[%s2559_s11 + $0xb0] sm:$0xff] %vm1622_vm3, %v1584_v60  ;;  %v1585_v2 = vmax.f32 %v1525_v61, 0.0 }
 0x127   : > { %1643 = vst.msk [vmem:[%s2559_s11 + $0xa0] sm:$0xff] %vm1622_vm3, %v1582_v63  ;;  %v1583_v3 = vmax.f32 %v1523_v0, 0.0  ;;  %v2033_v4 = vpop.f32.mrb[24].mxu1  ;;  %v2103_v13 = vpop.f32.mrb[32].mxu0 }
 0x128   : > { %1646 = vst.msk [vmem:[%s2559_s11 + $0xb8] sm:$0xff] %vm1622_vm3, %v1585_v2  ;;  %v1361_v5 = vadd.f32 %v2095_v36, %v2033_v4  ;;  %v832_v6 = vpop.f32.mrb[25].mxu1  ;;  %v1384_v16 = vpop.f32.mrb[33].mxu0 }
 0x129   : > { %1644 = vst.msk [vmem:[%s2559_s11 + $0xa8] sm:$0xff] %vm1622_vm3, %v1583_v3  ;;  %v1353_v7 = vadd.f32 %v1352_v39, %v832_v6  ;;  %v2034_v8 = vpop.f32.mrb[26].mxu1  ;;  %v2104_v19 = vpop.f32.mrb[34].mxu0 }
 0x12a   : > { %v1528_v9 = vadd.f32 %v2553_v11, %v1361_v5  ;;  %v1364_v10 = vadd.f32 %v2096_v42, %v2034_v8  ;;  %v835_v12 = vpop.f32.mrb[27].mxu1  ;;  %v1387_v22 = vpop.f32.mrb[35].mxu0 }
 0x12b   : > { %v1526_v14 = vadd.f32 %v2553_v11, %v1353_v7  ;;  %v1356_v15 = vadd.f32 %v1355_v45, %v835_v12 }
 0x12c   : > { %v1588_v17 = vmax.f32 %v1528_v9, 0.0  ;;  %v1529_v18 = vadd.f32 %v2553_v11, %v1364_v10 }
 0x12d   : > { %v1586_v20 = vmax.f32 %v1526_v14, 0.0  ;;  %v1527_v21 = vadd.f32 %v2553_v11, %v1356_v15 }
 0x12e   : > { %1649 = vst.msk [vmem:[%s2559_s11 + $0xd0] sm:$0xff] %vm1622_vm3, %v1588_v17  ;;  %v1589_v23 = vmax.f32 %v1529_v18, 0.0 }
 0x12f   : > { %1647 = vst.msk [vmem:[%s2559_s11 + $0xc0] sm:$0xff] %vm1622_vm3, %v1586_v20  ;;  %v1587_v24 = vmax.f32 %v1527_v21, 0.0  ;;  %v2037_v25 = vpop.f32.mrb[28].mxu1  ;;  %v2107_v33 = vpop.f32.mrb[36].mxu0 }
 0x130   : > { %1650 = vst.msk [vmem:[%s2559_s11 + $0xd8] sm:$0xff] %vm1622_vm3, %v1589_v23  ;;  %v1377_v26 = vadd.f32 %v2099_v56, %v2037_v25  ;;  %v848_v27 = vpop.f32.mrb[29].mxu1  ;;  %v1400_v36 = vpop.f32.mrb[37].mxu0 }
 0x131   : > { %1648 = vst.msk [vmem:[%s2559_s11 + $0xc8] sm:$0xff] %vm1622_vm3, %v1587_v24  ;;  %v1369_v28 = vadd.f32 %v1368_v59, %v848_v27  ;;  %v2038_v29 = vpop.f32.mrb[30].mxu1  ;;  %v2108_v39 = vpop.f32.mrb[38].mxu0 }
 0x132   : > { %v1532_v30 = vadd.f32 %v2553_v11, %v1377_v26  ;;  %v1380_v31 = vadd.f32 %v2100_v62, %v2038_v29  ;;  %v851_v32 = vpop.f32.mrb[31].mxu1  ;;  %v1403_v42 = vpop.f32.mrb[39].mxu0 }
 0x133   : > { %v1530_v34 = vadd.f32 %v2553_v11, %v1369_v28  ;;  %v1372_v35 = vadd.f32 %v1371_v1, %v851_v32 }
 0x134   : > { %v1592_v37 = vmax.f32 %v1532_v30, 0.0  ;;  %v1533_v38 = vadd.f32 %v2553_v11, %v1380_v31 }
 0x135   : > { %v1590_v40 = vmax.f32 %v1530_v34, 0.0  ;;  %v1531_v41 = vadd.f32 %v2553_v11, %v1372_v35 }
 0x136   : > { %1653 = vst.msk [vmem:[%s2559_s11 + $0xf0] sm:$0xff] %vm1622_vm3, %v1592_v37  ;;  %v1593_v43 = vmax.f32 %v1533_v38, 0.0 }
 0x137   : > { %1651 = vst.msk [vmem:[%s2559_s11 + $0xe0] sm:$0xff] %vm1622_vm3, %v1590_v40  ;;  %v1591_v44 = vmax.f32 %v1531_v41, 0.0  ;;  %v2041_v45 = vpop.f32.mrb[32].mxu1  ;;  %v2111_v53 = vpop.f32.mrb[40].mxu0 }
 0x138   : > { %1654 = vst.msk [vmem:[%s2559_s11 + $0xf8] sm:$0xff] %vm1622_vm3, %v1593_v43  ;;  %v1393_v46 = vadd.f32 %v2103_v13, %v2041_v45  ;;  %v864_v47 = vpop.f32.mrb[33].mxu1  ;;  %v1416_v56 = vpop.f32.mrb[41].mxu0 }
 0x139   : > { %1652 = vst.msk [vmem:[%s2559_s11 + $0xe8] sm:$0xff] %vm1622_vm3, %v1591_v44  ;;  %v1385_v48 = vadd.f32 %v1384_v16, %v864_v47  ;;  %v2042_v49 = vpop.f32.mrb[34].mxu1  ;;  %v2112_v59 = vpop.f32.mrb[42].mxu0 }
 0x13a   : > { %v1536_v50 = vadd.f32 %v2553_v11, %v1393_v46  ;;  %v1396_v51 = vadd.f32 %v2104_v19, %v2042_v49  ;;  %v867_v52 = vpop.f32.mrb[35].mxu1  ;;  %v1419_v62 = vpop.f32.mrb[43].mxu0 }
 0x13b   : > { %v1534_v54 = vadd.f32 %v2553_v11, %v1385_v48  ;;  %v1388_v55 = vadd.f32 %v1387_v22, %v867_v52 }
 0x13c   : > { %v1596_v57 = vmax.f32 %v1536_v50, 0.0  ;;  %v1537_v58 = vadd.f32 %v2553_v11, %v1396_v51 }
 0x13d   : > { %v1594_v60 = vmax.f32 %v1534_v54, 0.0  ;;  %v1535_v61 = vadd.f32 %v2553_v11, %v1388_v55 }
 0x13e   : > { %1657 = vst.msk [vmem:[%s2559_s11 + $0x110] sm:$0xff] %vm1622_vm3, %v1596_v57  ;;  %v1597_v63 = vmax.f32 %v1537_v58, 0.0 }
 0x13f   : > { %1655 = vst.msk [vmem:[%s2559_s11 + $0x100] sm:$0xff] %vm1622_vm3, %v1594_v60  ;;  %v1595_v0 = vmax.f32 %v1535_v61, 0.0  ;;  %v2045_v1 = vpop.f32.mrb[36].mxu1  ;;  %v2115_v9 = vpop.f32.mrb[44].mxu0 }
 0x140   : > { %1658 = vst.msk [vmem:[%s2559_s11 + $0x118] sm:$0xff] %vm1622_vm3, %v1597_v63  ;;  %v1409_v2 = vadd.f32 %v2107_v33, %v2045_v1  ;;  %v880_v3 = vpop.f32.mrb[37].mxu1  ;;  %v1432_v13 = vpop.f32.mrb[45].mxu0 }
 0x141   : > { %1656 = vst.msk [vmem:[%s2559_s11 + $0x108] sm:$0xff] %vm1622_vm3, %v1595_v0  ;;  %v1401_v4 = vadd.f32 %v1400_v36, %v880_v3  ;;  %v2046_v5 = vpop.f32.mrb[38].mxu1  ;;  %v2116_v16 = vpop.f32.mrb[46].mxu0 }
 0x142   : > { %v1540_v6 = vadd.f32 %v2553_v11, %v1409_v2  ;;  %v1412_v7 = vadd.f32 %v2108_v39, %v2046_v5  ;;  %v883_v8 = vpop.f32.mrb[39].mxu1  ;;  %v1435_v19 = vpop.f32.mrb[47].mxu0 }
 0x143   : > { %v1538_v10 = vadd.f32 %v2553_v11, %v1401_v4  ;;  %v1404_v12 = vadd.f32 %v1403_v42, %v883_v8 }
 0x144   : > { %v1600_v14 = vmax.f32 %v1540_v6, 0.0  ;;  %v1541_v15 = vadd.f32 %v2553_v11, %v1412_v7 }
 0x145   : > { %v1598_v17 = vmax.f32 %v1538_v10, 0.0  ;;  %v1539_v18 = vadd.f32 %v2553_v11, %v1404_v12 }
 0x146   : > { %1661 = vst.msk [vmem:[%s2559_s11 + $0x130] sm:$0xff] %vm1622_vm3, %v1600_v14  ;;  %v1601_v20 = vmax.f32 %v1541_v15, 0.0 }
 0x147   : > { %1659 = vst.msk [vmem:[%s2559_s11 + $0x120] sm:$0xff] %vm1622_vm3, %v1598_v17  ;;  %v1599_v21 = vmax.f32 %v1539_v18, 0.0  ;;  %v2049_v22 = vpop.f32.mrb[40].mxu1  ;;  %v2119_v30 = vpop.f32.mrb[48].mxu0 }
 0x148   : > { %1662 = vst.msk [vmem:[%s2559_s11 + $0x138] sm:$0xff] %vm1622_vm3, %v1601_v20  ;;  %v1425_v23 = vadd.f32 %v2111_v53, %v2049_v22  ;;  %v896_v24 = vpop.f32.mrb[41].mxu1  ;;  %v1448_v33 = vpop.f32.mrb[49].mxu0 }
 0x149   : > { %1660 = vst.msk [vmem:[%s2559_s11 + $0x128] sm:$0xff] %vm1622_vm3, %v1599_v21  ;;  %v1417_v25 = vadd.f32 %v1416_v56, %v896_v24  ;;  %v2050_v26 = vpop.f32.mrb[42].mxu1  ;;  %v2120_v36 = vpop.f32.mrb[50].mxu0 }
 0x14a   : > { %v1544_v27 = vadd.f32 %v2553_v11, %v1425_v23  ;;  %v1428_v28 = vadd.f32 %v2112_v59, %v2050_v26  ;;  %v899_v29 = vpop.f32.mrb[43].mxu1  ;;  %v1451_v39 = vpop.f32.mrb[51].mxu0 }
 0x14b   : > { %v1542_v31 = vadd.f32 %v2553_v11, %v1417_v25  ;;  %v1420_v32 = vadd.f32 %v1419_v62, %v899_v29 }
 0x14c   : > { %v1604_v34 = vmax.f32 %v1544_v27, 0.0  ;;  %v1545_v35 = vadd.f32 %v2553_v11, %v1428_v28 }
 0x14d   : > { %v1602_v37 = vmax.f32 %v1542_v31, 0.0  ;;  %v1543_v38 = vadd.f32 %v2553_v11, %v1420_v32 }
 0x14e   : > { %1665 = vst.msk [vmem:[%s2559_s11 + $0x150] sm:$0xff] %vm1622_vm3, %v1604_v34  ;;  %v1605_v40 = vmax.f32 %v1545_v35, 0.0 }
 0x14f   : > { %1663 = vst.msk [vmem:[%s2559_s11 + $0x140] sm:$0xff] %vm1622_vm3, %v1602_v37  ;;  %v1603_v41 = vmax.f32 %v1543_v38, 0.0  ;;  %v2053_v42 = vpop.f32.mrb[44].mxu1  ;;  %v2123_v50 = vpop.f32.mrb[52].mxu0 }
 0x150   : > { %1666 = vst.msk [vmem:[%s2559_s11 + $0x158] sm:$0xff] %vm1622_vm3, %v1605_v40  ;;  %v1441_v43 = vadd.f32 %v2115_v9, %v2053_v42  ;;  %v912_v44 = vpop.f32.mrb[45].mxu1  ;;  %v1464_v53 = vpop.f32.mrb[53].mxu0 }
 0x151   : > { %1664 = vst.msk [vmem:[%s2559_s11 + $0x148] sm:$0xff] %vm1622_vm3, %v1603_v41  ;;  %v1433_v45 = vadd.f32 %v1432_v13, %v912_v44  ;;  %v2054_v46 = vpop.f32.mrb[46].mxu1  ;;  %v2124_v56 = vpop.f32.mrb[54].mxu0 }
 0x152   : > { %v1548_v47 = vadd.f32 %v2553_v11, %v1441_v43  ;;  %v1444_v48 = vadd.f32 %v2116_v16, %v2054_v46  ;;  %v915_v49 = vpop.f32.mrb[47].mxu1  ;;  %v1467_v59 = vpop.f32.mrb[55].mxu0 }
 0x153   : > { %v1546_v51 = vadd.f32 %v2553_v11, %v1433_v45  ;;  %v1436_v52 = vadd.f32 %v1435_v19, %v915_v49 }
 0x154   : > { %v1608_v54 = vmax.f32 %v1548_v47, 0.0  ;;  %v1549_v55 = vadd.f32 %v2553_v11, %v1444_v48 }
 0x155   : > { %v1606_v57 = vmax.f32 %v1546_v51, 0.0  ;;  %v1547_v58 = vadd.f32 %v2553_v11, %v1436_v52 }
 0x156   : > { %1669 = vst.msk [vmem:[%s2559_s11 + $0x170] sm:$0xff] %vm1622_vm3, %v1608_v54  ;;  %v1609_v60 = vmax.f32 %v1549_v55, 0.0 }
 0x157   : > { %1667 = vst.msk [vmem:[%s2559_s11 + $0x160] sm:$0xff] %vm1622_vm3, %v1606_v57  ;;  %v1607_v61 = vmax.f32 %v1547_v58, 0.0  ;;  %v2057_v62 = vpop.f32.mrb[48].mxu1  ;;  %v2127_v6 = vpop.f32.mrb[56].mxu0 }
 0x158   : > { %1670 = vst.msk [vmem:[%s2559_s11 + $0x178] sm:$0xff] %vm1622_vm3, %v1609_v60  ;;  %v1457_v63 = vadd.f32 %v2119_v30, %v2057_v62  ;;  %v928_v0 = vpop.f32.mrb[49].mxu1  ;;  %v1480_v9 = vpop.f32.mrb[57].mxu0 }
 0x159   : > { %1668 = vst.msk [vmem:[%s2559_s11 + $0x168] sm:$0xff] %vm1622_vm3, %v1607_v61  ;;  %v1449_v1 = vadd.f32 %v1448_v33, %v928_v0  ;;  %v2058_v2 = vpop.f32.mrb[50].mxu1  ;;  %v2128_v13 = vpop.f32.mrb[58].mxu0 }
 0x15a   : > { %v1552_v3 = vadd.f32 %v2553_v11, %v1457_v63  ;;  %v1460_v4 = vadd.f32 %v2120_v36, %v2058_v2  ;;  %v931_v5 = vpop.f32.mrb[51].mxu1  ;;  %v1483_v16 = vpop.f32.mrb[59].mxu0 }
 0x15b   : > { %v1550_v7 = vadd.f32 %v2553_v11, %v1449_v1  ;;  %v1452_v8 = vadd.f32 %v1451_v39, %v931_v5 }
 0x15c   : > { %v1612_v10 = vmax.f32 %v1552_v3, 0.0  ;;  %v1553_v12 = vadd.f32 %v2553_v11, %v1460_v4 }
 0x15d   : > { %v1610_v14 = vmax.f32 %v1550_v7, 0.0  ;;  %v1551_v15 = vadd.f32 %v2553_v11, %v1452_v8 }
 0x15e   : > { %1673 = vst.msk [vmem:[%s2559_s11 + $0x190] sm:$0xff] %vm1622_vm3, %v1612_v10  ;;  %v1613_v17 = vmax.f32 %v1553_v12, 0.0 }
 0x15f   : > { %1671 = vst.msk [vmem:[%s2559_s11 + $0x180] sm:$0xff] %vm1622_vm3, %v1610_v14  ;;  %v1611_v18 = vmax.f32 %v1551_v15, 0.0  ;;  %v2061_v19 = vpop.f32.mrb[52].mxu1 }
 0x160   : > { %1674 = vst.msk [vmem:[%s2559_s11 + $0x198] sm:$0xff] %vm1622_vm3, %v1613_v17  ;;  %v1473_v20 = vadd.f32 %v2123_v50, %v2061_v19  ;;  %v944_v21 = vpop.f32.mrb[53].mxu1 }
 0x161   : > { %1672 = vst.msk [vmem:[%s2559_s11 + $0x188] sm:$0xff] %vm1622_vm3, %v1611_v18  ;;  %v1465_v22 = vadd.f32 %v1464_v53, %v944_v21  ;;  %v2062_v23 = vpop.f32.mrb[54].mxu1 }
 0x162   : > { %v1556_v24 = vadd.f32 %v2553_v11, %v1473_v20  ;;  %v1476_v25 = vadd.f32 %v2124_v56, %v2062_v23  ;;  %v947_v26 = vpop.f32.mrb[55].mxu1 }
 0x163   : > { %v1554_v27 = vadd.f32 %v2553_v11, %v1465_v22  ;;  %v1468_v28 = vadd.f32 %v1467_v59, %v947_v26 }
 0x164   : > { %v1616_v29 = vmax.f32 %v1556_v24, 0.0  ;;  %v1557_v30 = vadd.f32 %v2553_v11, %v1476_v25 }
 0x165   : > { %v1614_v31 = vmax.f32 %v1554_v27, 0.0  ;;  %v1555_v32 = vadd.f32 %v2553_v11, %v1468_v28 }
 0x166   : > { %1677 = vst.msk [vmem:[%s2559_s11 + $0x1b0] sm:$0xff] %vm1622_vm3, %v1616_v29  ;;  %v1617_v33 = vmax.f32 %v1557_v30, 0.0 }
 0x167   : > { %1675 = vst.msk [vmem:[%s2559_s11 + $0x1a0] sm:$0xff] %vm1622_vm3, %v1614_v31  ;;  %v1615_v34 = vmax.f32 %v1555_v32, 0.0  ;;  %v2065_v35 = vpop.f32.mrb[56].mxu1 }
 0x168   : > { %1678 = vst.msk [vmem:[%s2559_s11 + $0x1b8] sm:$0xff] %vm1622_vm3, %v1617_v33  ;;  %v1489_v36 = vadd.f32 %v2127_v6, %v2065_v35  ;;  %v960_v37 = vpop.f32.mrb[57].mxu1 }
 0x169   : > { %1676 = vst.msk [vmem:[%s2559_s11 + $0x1a8] sm:$0xff] %vm1622_vm3, %v1615_v34  ;;  %v1481_v38 = vadd.f32 %v1480_v9, %v960_v37  ;;  %v2066_v39 = vpop.f32.mrb[58].mxu1 }
 0x16a   : > { %v1560_v40 = vadd.f32 %v2553_v11, %v1489_v36  ;;  %v1492_v41 = vadd.f32 %v2128_v13, %v2066_v39  ;;  %v963_v42 = vpop.f32.mrb[59].mxu1 }
 0x16b   : > { %v1558_v43 = vadd.f32 %v2553_v11, %v1481_v38  ;;  %v1484_v44 = vadd.f32 %v1483_v16, %v963_v42 }
 0x16c   : > { %v1620_v45 = vmax.f32 %v1560_v40, 0.0  ;;  %v1561_v46 = vadd.f32 %v2553_v11, %v1492_v41 }
 0x16d   : > { %v1618_v47 = vmax.f32 %v1558_v43, 0.0  ;;  %v1559_v48 = vadd.f32 %v2553_v11, %v1484_v44 }
 0x16e   : > { %1681 = vst.msk [vmem:[%s2559_s11 + $0x1d0] sm:$0xff] %vm1622_vm3, %v1620_v45  ;;  %v1621_v49 = vmax.f32 %v1561_v46, 0.0 }
 0x16f   : > { %1679 = vst.msk [vmem:[%s2559_s11 + $0x1c0] sm:$0xff] %vm1622_vm3, %v1618_v47  ;;  %v1619_v50 = vmax.f32 %v1559_v48, 0.0 }
 0x170   : > { %1682 = vst.msk [vmem:[%s2559_s11 + $0x1d8] sm:$0xff] %vm1622_vm3, %v1621_v49 }
 0x171   : > { %1680 = vst.msk [vmem:[%s2559_s11 + $0x1c8] sm:$0xff] %vm1622_vm3, %v1619_v50 }
 0x172 PF: > { %s15_s20 = sadd.s32 1, %s2304_s20   ;;  %s2755_s18 = smov %s2300_s19 }
 0x173   : > { %p12_p5 = scmp.ge.s32.totalorder %s15_s20, 4   ;;  %s2756_s19 = smov %s2758_s21 }
 0x175   :  { %14 = sbr.rel (!%p12_p5) target bundleno = 2 (0x2), region = 76 }

</bundles_post_ra>
